<compile_context>
chip_gen: v7x
topology: tpu7x:2x2x1
jax: 0.10.0
libtpu: 0.0.40
codegen_flags: <defaults>
</compile_context>

<pallas_src>
import math
from functools import partial

import jax
import jax.numpy as jnp
from jax import lax
from jax.experimental import pallas as pl
from jax.experimental.pallas import tpu as pltpu


# Conservative per-kernel scoped VMEM budget: fits v7x (64 MiB physical) with headroom,
# and is an explicit raise above the 16/32 MiB default scoped limits on v5e/v6e.
_VMEM_BUDGET_BYTES = 48 * 1024 * 1024


# ----------------------------- tiling helpers -----------------------------

def _pick_row_tile(n, est_fn, prefs=(512, 256, 128)):
    """Largest preferred tile that divides n and fits the VMEM budget; full extent if n is
    small; otherwise the smallest preference (Pallas clips edge blocks)."""
    if n <= prefs[-1]:
        return n
    for p in prefs:
        if n % p == 0 and est_fn(p) <= _VMEM_BUDGET_BYTES:
            return p
    return prefs[-1]


def _pick_q_tile(s, est_fn):
    """Query-tile size: keep >= 256 for MXU occupancy (D is the contraction depth and is
    already small); full extent for short sequences."""
    if s <= 256:
        return s
    for p in (512, 256):
        if s % p == 0 and est_fn(p) <= _VMEM_BUDGET_BYTES:
            return p
    return 256


def _head_group_width(head_dim, hidden):
    """Lane width of one head-group block: smallest multiple of head_dim that is a multiple
    of 128 and divides hidden (e.g. 128 = a head pair for D=64); full hidden otherwise."""
    lcm = head_dim * 128 // math.gcd(head_dim, 128)
    if lcm < hidden and hidden % lcm == 0:
        return lcm
    return hidden


# ----------------------------- Fused QKV projection kernel -----------------------------

def _qkv_kernel(x_ref, w_ref, b_ref, o_ref, *, hidden):
    # x: (tm, K); w: (K, 3*hidden) = [Wq*scale | Wk | Wv]; b: (1, 3*hidden); o: (3, tm, hidden)
    y = jnp.dot(x_ref[...], w_ref[...], preferred_element_type=jnp.float32)
    y = y + b_ref[...].astype(jnp.float32)
    # Split [q | k | v] along lanes (hidden is a multiple of 128 in realistic configs,
    # so these slices are lane-aligned).
    o_ref[0] = y[:, :hidden].astype(o_ref.dtype)
    o_ref[1] = y[:, hidden:2 * hidden].astype(o_ref.dtype)
    o_ref[2] = y[:, 2 * hidden:].astype(o_ref.dtype)


def pallas_qkv_proj(x2d, w_qkv, b_qkv, hidden, out_dtype):
    """x2d: (M, K); w_qkv: (K, 3*hidden); b_qkv: (1, 3*hidden).
    Returns stacked (3, M, hidden) = [q*scale, k, v] in out_dtype."""
    M, K = x2d.shape
    three_n = w_qkv.shape[1]
    in_bytes = jnp.dtype(x2d.dtype).itemsize
    out_bytes = jnp.dtype(out_dtype).itemsize

    def est(tm):
        return (2 * tm * K * in_bytes            # x tile (double-buffered)
                + 2 * K * three_n * in_bytes     # fused weight (double-buffered, constant idx)
                + 2 * three_n * in_bytes         # fused bias
                + 2 * 3 * tm * hidden * out_bytes  # stacked output tile
                + tm * three_n * 4)              # f32 epilogue working set (rough)

    tm = _pick_row_tile(M, est)
    grid = (pl.cdiv(M, tm),)
    return pl.pallas_call(
        partial(_qkv_kernel, hidden=hidden),
        out_shape=jax.ShapeDtypeStruct((3, M, hidden), out_dtype),
        grid=grid,
        in_specs=[
            pl.BlockSpec((tm, K), lambda i: (i, 0)),
            pl.BlockSpec((K, three_n), lambda i: (0, 0)),
            pl.BlockSpec((1, three_n), lambda i: (0, 0)),
        ],
        out_specs=pl.BlockSpec((3, tm, hidden), lambda i: (0, i, 0)),
        compiler_params=pltpu.CompilerParams(
            dimension_semantics=("parallel",),
            vmem_limit_bytes=_VMEM_BUDGET_BYTES),
    )(x2d, w_qkv, b_qkv)


# ----------------------------- Attention kernel (batch, head-group, query-tile) -----------

def _attn_kernel(q_ref, k_ref, v_ref, bias_ref, o_ref, *, heads_per_group, head_dim):
    # q: (1, 1, tq, gw)  k/v: (1, 1, S, gw)  bias: (1, S)  o: (1, tq, gw);  gw = hpg * D
    q = q_ref[0, 0]                                       # (tq, gw); 1/sqrt(D) pre-folded
    k = k_ref[0, 0]                                       # (S,  gw)
    v = v_ref[0, 0]                                       # (S,  gw)
    bias = bias_ref[...].astype(jnp.float32)              # (1, S), broadcasts over queries

    parts = []
    for h in range(heads_per_group):                      # tiny static loop (1-2 heads/group)
        lo = h * head_dim
        qh = q[:, lo:lo + head_dim]                       # (tq, D)
        kh = k[:, lo:lo + head_dim]                       # (S, D)
        vh = v[:, lo:lo + head_dim]                       # (S, D)
        # scores: contract over D without materializing a transpose of k
        s = lax.dot_general(qh, kh, (((1,), (1,)), ((), ())),
                            preferred_element_type=jnp.float32)       # (tq, S)
        s = s + bias
        s = s - jnp.max(s, axis=-1, keepdims=True)
        p = jnp.exp(s)                                    # f32 softmax math
        p = p * pl.reciprocal(jnp.sum(p, axis=-1, keepdims=True), approx=True)
        parts.append(lax.dot_general(p.astype(vh.dtype), vh, (((1,), (0,)), ((), ())),
                                     preferred_element_type=jnp.float32))  # (tq, D)

    ctx = parts[0] if heads_per_group == 1 else jnp.concatenate(parts, axis=-1)
    # Single lane-dense store of the whole group slab (>=128 lanes in realistic configs).
    o_ref[0] = ctx.astype(o_ref.dtype)


def pallas_attention(qkv, bias, num_heads, out_dtype):
    """qkv: (3, B, S, hidden) stacked [q*scale, k, v]; bias: (B, S) additive key bias.
    Returns context in (B, S, hidden) layout (heads already merged), dtype out_dtype."""
    _, B, S, hidden = qkv.shape
    D = hidden // num_heads
    gw = _head_group_width(D, hidden)          # head-group lane width (e.g. 128 for D=64)
    hpg = gw // D                              # heads per group
    num_groups = hidden // gw

    qkv_bytes = jnp.dtype(qkv.dtype).itemsize
    out_bytes = jnp.dtype(out_dtype).itemsize

    def est(tq):
        return (2 * tq * gw * qkv_bytes        # q tile
                + 4 * S * gw * qkv_bytes       # k + v blocks (double-buffered)
                + 2 * S * 4                    # bias
                + 2 * tq * gw * out_bytes      # output tile
                + hpg * tq * S * 4)            # f32 scores/probs working set (rough)

    tq = _pick_q_tile(S, est)
    grid = (B, num_groups, pl.cdiv(S, tq))     # query-tile innermost -> K/V DMA reused
    return pl.pallas_call(
        partial(_attn_kernel, heads_per_group=hpg, head_dim=D),
        out_shape=jax.ShapeDtypeStruct((B, S, hidden), out_dtype),
        grid=grid,
        in_specs=[
            pl.BlockSpec((1, 1, tq, gw), lambda b, g, qi: (0, b, qi, g)),   # q tile
            pl.BlockSpec((1, 1, S, gw), lambda b, g, qi: (1, b, 0, g)),     # k (per b, group)
            pl.BlockSpec((1, 1, S, gw), lambda b, g, qi: (2, b, 0, g)),     # v (per b, group)
            pl.BlockSpec((1, S), lambda b, g, qi: (b, 0)),                  # bias
        ],
        out_specs=pl.BlockSpec((1, tq, gw), lambda b, g, qi: (b, qi, g)),
        compiler_params=pltpu.CompilerParams(
            dimension_semantics=("parallel", "parallel", "parallel"),
            vmem_limit_bytes=_VMEM_BUDGET_BYTES),
    )(qkv, qkv, qkv, bias)


# ----------------------------- Module wrapper -----------------------------

def init_params(key, hidden_size, num_heads, dtype=jnp.float32):
    """Deterministic Linear inits (nn.Linear shapes; stored pre-transposed as (in, out))."""
    ks = jax.random.split(key, 6)
    bound = 1.0 / (hidden_size ** 0.5)

    def u(k, shape):
        return jax.random.uniform(k, shape, dtype=dtype, minval=-bound, maxval=bound)

    return {
        "wq": u(ks[0], (hidden_size, hidden_size)),
        "bq": u(ks[1], (hidden_size,)),
        "wk": u(ks[2], (hidden_size, hidden_size)),
        "bk": u(ks[3], (hidden_size,)),
        "wv": u(ks[4], (hidden_size, hidden_size)),
        "bv": u(ks[5], (hidden_size,)),
    }


def bert_self_attention_xf(hidden_states, attention_mask, params, num_heads,
                           compute_dtype=None):
    """Forward of BertSelfAttentionWithXF (encoder, p=0, no out_proj).

    hidden_states: (B, S, hidden); attention_mask: HF additive mask (B, 1, 1, S) or None.
    compute_dtype: matmul operand / qkv-intermediate dtype (pass jnp.bfloat16 for the
      native MXU path; accumulation and softmax stay in f32).  Default: input dtype.
    Returns context_layer (B, S, hidden)  [module returns (context_layer,)].
    """
    B, S, hidden = hidden_states.shape
    if hidden % num_heads != 0:
        raise ValueError("hidden_size must be a multiple of num_heads")
    D = hidden // num_heads
    scale = 1.0 / math.sqrt(D)
    out_dtype = hidden_states.dtype
    if compute_dtype is None:
        compute_dtype = hidden_states.dtype

    # Fuse [Wq*scale | Wk | Wv] into one weight (single MXU weight stream per tile);
    # 1/sqrt(D) folded into the q columns so it costs nothing at runtime.
    w_qkv = jnp.concatenate(
        [params["wq"] * scale, params["wk"], params["wv"]], axis=1).astype(compute_dtype)
    b_qkv = jnp.concatenate(
        [params["bq"] * scale, params["bk"], params["bv"]]
    ).reshape(1, 3 * hidden).astype(compute_dtype)

    x2d = hidden_states.reshape(B * S, hidden).astype(compute_dtype)
    qkv = pallas_qkv_proj(x2d, w_qkv, b_qkv, hidden, compute_dtype)   # (3, B*S, hidden)
    qkv = qkv.reshape(3, B, S, hidden)       # pure dim-split reshape, no data movement

    if attention_mask is not None:
        if attention_mask.shape != (B, 1, 1, S):
            raise ValueError(
                f"expected HF additive mask of shape {(B, 1, 1, S)}, got {attention_mask.shape}")
        bias = attention_mask.reshape(B, S).astype(jnp.float32)
    else:
        bias = jnp.zeros((B, S), dtype=jnp.float32)

    return pallas_attention(qkv, bias, num_heads, out_dtype)   # (B, S, hidden), heads merged


# ----------------------------- Reference (pure JAX) for sanity -----------------------------

def _reference(hidden_states, attention_mask, params, num_heads):
    B, S, hidden = hidden_states.shape
    D = hidden // num_heads
    q = hidden_states @ params["wq"] + params["bq"]
    k = hidden_states @ params["wk"] + params["bk"]
    v = hidden_states @ params["wv"] + params["bv"]
    q = q.reshape(B, S, num_heads, D).transpose(0, 2, 1, 3).astype(jnp.float32)
    k = k.reshape(B, S, num_heads, D).transpose(0, 2, 1, 3).astype(jnp.float32)
    v = v.reshape(B, S, num_heads, D).transpose(0, 2, 1, 3).astype(jnp.float32)
    s = jnp.einsum("bhqd,bhkd->bhqk", q * (1.0 / D ** 0.5), k)
    if attention_mask is not None:
        s = s + attention_mask.astype(jnp.float32)  # (B,1,1,S) broadcasts
    p = jax.nn.softmax(s, axis=-1)
    o = jnp.einsum("bhqk,bhkd->bhqd", p, v)
    return o.transpose(0, 2, 1, 3).reshape(B, S, hidden).astype(hidden_states.dtype)


# ----------------------------- Main -----------------------------

if __name__ == "__main__":
    B, S, hidden, num_heads = 2, 8, 32, 4

    key = jax.random.PRNGKey(0)
    k_x, k_m, k_p = jax.random.split(key, 3)

    hidden_states = jax.random.normal(k_x, (B, S, hidden), dtype=jnp.float32)
    # HF-style additive attention mask: 0 for attend, -10000 for masked, shape (B,1,1,S)
    pad = (jax.random.uniform(k_m, (B, 1, 1, S)) > 0.8).astype(jnp.float32)
    attention_mask = pad * -10000.0

    params = init_params(k_p, hidden, num_heads)

    # f32 path (tight check; only approximation is the EUP reciprocal in the softmax denom).
    out = bert_self_attention_xf(hidden_states, attention_mask, params, num_heads)
    out = jax.block_until_ready(out)

    ref = _reference(hidden_states, attention_mask, params, num_heads)
    assert out.shape == (B, S, hidden)
    assert jnp.allclose(out, ref, atol=2e-3, rtol=2e-3), "f32 mismatch vs reference"

    # bf16 MXU path (production configuration): operands/qkv bf16, f32 accumulation+softmax.
    out_bf16 = bert_self_attention_xf(hidden_states, attention_mask, params, num_heads,
                                      compute_dtype=jnp.bfloat16)
    out_bf16 = jax.block_until_ready(out_bf16)
    assert out_bf16.shape == (B, S, hidden) and out_bf16.dtype == hidden_states.dtype
    assert jnp.allclose(out_bf16.astype(jnp.float32), ref.astype(jnp.float32),
                        atol=7e-2, rtol=7e-2), "bf16 mismatch vs reference"

    print("KERNEL_OK")
</pallas_src>

<mosaic_0001>
module attributes {stable_mosaic.version = 11 : i64} {
  func.func @_qkv_kernel(%arg0: i32, %arg1: memref<16x32xf32, #tpu.memory_space<vmem>>, %arg2: memref<32x96xf32, #tpu.memory_space<vmem>>, %arg3: memref<1x96xf32, #tpu.memory_space<vmem>>, %arg4: memref<3x16x32xf32, #tpu.memory_space<vmem>>) attributes {dimension_semantics = [#tpu.dimension_semantics<parallel>], iteration_bounds = array<i64: 1>, scalar_prefetch = 0 : i64, scratch_operands = 0 : i64, tpu.core_type = #tpu.core_type<tc>, window_params = [{transform_indices = @transform_0, window_bounds = array<i64: 16, 32>}, {pipeline_mode = #tpu.pipeline_mode<synchronous>, transform_indices = @transform_1, window_bounds = array<i64: 32, 96>}, {pipeline_mode = #tpu.pipeline_mode<synchronous>, transform_indices = @transform_2, window_bounds = array<i64: 1, 96>}, {transform_indices = @transform_3, window_bounds = array<i64: 3, 16, 32>}]} {
    %c0 = arith.constant 0 : index
    %c0_0 = arith.constant 0 : index
    %0 = vector.load %arg1[%c0, %c0_0] : memref<16x32xf32, #tpu.memory_space<vmem>>, vector<16x32xf32>
    %c0_1 = arith.constant 0 : index
    %c0_2 = arith.constant 0 : index
    %1 = vector.load %arg2[%c0_1, %c0_2] : memref<32x96xf32, #tpu.memory_space<vmem>>, vector<32x96xf32>
    %cst = arith.constant dense<0.000000e+00> : vector<16x96xf32>
    %2 = tpu.matmul %0, %1, %cst {dimension_numbers = #tpu.dot_dimension_numbers<[1], [0], [0], [1], [0, 0, 1, 1], [], []>} : vector<16x32xf32>, vector<32x96xf32>, vector<16x96xf32> -> vector<16x96xf32>
    %c0_3 = arith.constant 0 : index
    %c0_4 = arith.constant 0 : index
    %3 = vector.load %arg3[%c0_3, %c0_4] : memref<1x96xf32, #tpu.memory_space<vmem>>, vector<1x96xf32>
    %4 = vector.broadcast %3 : vector<1x96xf32> to vector<16x96xf32>
    %5 = arith.addf %2, %4 : vector<16x96xf32>
    %6 = vector.extract_strided_slice %5 {offsets = [0, 0], sizes = [16, 32], strides = [1, 1]} : vector<16x96xf32> to vector<16x32xf32>
    %c0_5 = arith.constant 0 : index
    %c0_6 = arith.constant 0 : index
    %c0_7 = arith.constant 0 : index
    %7 = vector.load %arg4[%c0_5, %c0_6, %c0_7] : memref<3x16x32xf32, #tpu.memory_space<vmem>>, vector<1x16x32xf32>
    %8 = vector.shape_cast %7 : vector<1x16x32xf32> to vector<16x32xf32>
    %9 = vector.shape_cast %6 : vector<16x32xf32> to vector<1x16x32xf32>
    tpu.vector_store %arg4[%c0_5, %c0_6, %c0_7], %9 {strides = array<i32>} : memref<3x16x32xf32, #tpu.memory_space<vmem>>, vector<1x16x32xf32>,
    %10 = vector.extract_strided_slice %5 {offsets = [0, 32], sizes = [16, 32], strides = [1, 1]} : vector<16x96xf32> to vector<16x32xf32>
    %c1 = arith.constant 1 : index
    %c0_8 = arith.constant 0 : index
    %c0_9 = arith.constant 0 : index
    %11 = vector.load %arg4[%c1, %c0_8, %c0_9] : memref<3x16x32xf32, #tpu.memory_space<vmem>>, vector<1x16x32xf32>
    %12 = vector.shape_cast %11 : vector<1x16x32xf32> to vector<16x32xf32>
    %13 = vector.shape_cast %10 : vector<16x32xf32> to vector<1x16x32xf32>
    tpu.vector_store %arg4[%c1, %c0_8, %c0_9], %13 {strides = array<i32>} : memref<3x16x32xf32, #tpu.memory_space<vmem>>, vector<1x16x32xf32>,
    %14 = vector.extract_strided_slice %5 {offsets = [0, 64], sizes = [16, 32], strides = [1, 1]} : vector<16x96xf32> to vector<16x32xf32>
    %c2 = arith.constant 2 : index
    %c0_10 = arith.constant 0 : index
    %c0_11 = arith.constant 0 : index
    %15 = vector.load %arg4[%c2, %c0_10, %c0_11] : memref<3x16x32xf32, #tpu.memory_space<vmem>>, vector<1x16x32xf32>
    %16 = vector.shape_cast %15 : vector<1x16x32xf32> to vector<16x32xf32>
    %17 = vector.shape_cast %14 : vector<16x32xf32> to vector<1x16x32xf32>
    tpu.vector_store %arg4[%c2, %c0_10, %c0_11], %17 {strides = array<i32>} : memref<3x16x32xf32, #tpu.memory_space<vmem>>, vector<1x16x32xf32>,
    return
  }
  func.func @transform_0(%arg0: i32) -> (i32, i32) {
    %c0_i32 = arith.constant 0 : i32
    %c0_i32_0 = arith.constant 0 : i32
    return %arg0, %c0_i32 : i32, i32
  }
  func.func @transform_1(%arg0: i32) -> (i32, i32) {
    %c0_i32 = arith.constant 0 : i32
    %c0_i32_0 = arith.constant 0 : i32
    %c0_i32_1 = arith.constant 0 : i32
    return %c0_i32, %c0_i32_0 : i32, i32
  }
  func.func @transform_2(%arg0: i32) -> (i32, i32) {
    %c0_i32 = arith.constant 0 : i32
    %c0_i32_0 = arith.constant 0 : i32
    %c0_i32_1 = arith.constant 0 : i32
    return %c0_i32, %c0_i32_0 : i32, i32
  }
  func.func @transform_3(%arg0: i32) -> (i32, i32, i32) {
    %c0_i32 = arith.constant 0 : i32
    %c0_i32_0 = arith.constant 0 : i32
    %c0_i32_1 = arith.constant 0 : i32
    return %c0_i32, %arg0, %c0_i32_0 : i32, i32, i32
  }
}

</mosaic_0001>

<bundles_post_ra>
// kernel: tpu_custom_call.1
= control target key start
LH: loop header
LB: loop body
LE: loop exit
PB: predicated region body
PF: predicated region fallthrough
CT: control target
= control target key end

     0   :  { %8 = vsyncpa [#allocation3], 0  ;;  %s368_s0 = inlined_call_operand.hbm [shape: f32[16,32], index: 0, kind: input, shape index: {}]   ;;  %s369_s1 = inlined_call_operand.hbm [shape: f32[32,96], index: 1, kind: input, shape index: {}]   ;;  %s370_s2 = inlined_call_operand.vmem [shape: f32[1,96], index: 2, kind: input, shape index: {}]   ;;  %s371_s3 = inlined_call_operand.hbm [shape: f32[3,16,32], index: 3, kind: output, shape index: {}]  }
   0x1   :  { %9 = vsyncpa [#allocation6], 0 }
   0x2   :  { %10 = vsyncpa [#allocation4], 0  ;;  %s285_s12 = smov [#allocation2]   ;;  %s213_s16 = scalar_lea.hbm %s368_s0, 256 }
   0x3   :  { %s16_s13 = sshll.u32 %s285_s12, 4  ;;  %p214_p0 = scmp.ne.s32.totalorder %s368_s0, %s213_s16  ;;  %s17_s13 = int_to_ptr.vmem [resolvable:$true] %s16_s13 }
   0x4   :  { %p217_p1 = scmp.lt.u32.totalorder %s213_s16, %s368_s0 }
   0x6   :  { %p219_p2 = pnand %p217_p1, %p214_p0 }
   0x8   :  { %222 = shalt.err (!%p219_p2)
}
   0x9   :  { %s223_s21 = scalar_lea.vmem %s17_s13, 256  ;;  %p228_p4 = scmp.lt.s32.totalorder %s17_s13, %s17_s13 }
   0xa   :  { %p224_p3 = scmp.ne.s32.totalorder %s17_s13, %s223_s21  ;;  %p229_p5 = scmp.lt.s32.totalorder %s223_s21, %s223_s21 }
   0xc   :  { %p230_p6 = por %p229_p5, %p228_p4 }
   0xe   :  { %p231_p7 = pnand %p230_p6, %p224_p3 }
  0x10   :  { %234 = shalt.err (!%p231_p7)
}
  0x11   :  { %s286_s22 = smov 128   ;;  %s287_s23 = smov 8  }
  0x12   :  { %22 = dma.hbm_to_vmem [thread:$0]  %s368_s0, 256, %s17_s13, [#allocation3], %s286_s22, %s286_s22, %s287_s23  }
  0x13   :  { %s288_s26 = smov [#allocation5]   ;;  %s235_s30 = scalar_lea.hbm %s369_s1, 512 }
  0x14   :  { %s28_s27 = sshll.u32 %s288_s26, 4  ;;  %p236_p8 = scmp.ne.s32.totalorder %s369_s1, %s235_s30  ;;  %s29_s27 = int_to_ptr.vmem [resolvable:$true] %s28_s27 }
  0x15   :  { %p239_p9 = scmp.lt.u32.totalorder %s235_s30, %s369_s1 }
  0x17   :  { %p241_p10 = pnand %p239_p9, %p236_p8 }
  0x19   :  { %244 = shalt.err (!%p241_p10)
}
  0x1a   :  { %s245_s8 = scalar_lea.vmem %s29_s27, 512  ;;  %p250_p12 = scmp.lt.s32.totalorder %s29_s27, %s29_s27 }
  0x1b   :  { %p246_p11 = scmp.ne.s32.totalorder %s29_s27, %s245_s8  ;;  %p251_p13 = scmp.lt.s32.totalorder %s245_s8, %s245_s8 }
  0x1d   :  { %p252_p0 = por %p251_p13, %p250_p12 }
  0x1f   :  { %p253_p1 = pnand %p252_p0, %p246_p11 }
  0x21   :  { %256 = shalt.err (!%p253_p1)
}
  0x22   :  { %34 = dma.hbm_to_vmem [thread:$0]  %s369_s1, 512, %s29_s27, [#allocation6], %s286_s22, %s286_s22, %s287_s23  }
  0x23   :  { %279 = dma.done.wait [#allocation3], 256  }
  0x24   :  { %280 = vsyncadd [#allocation3], 4294967040 }
  0x25   :  { %281 = dma.done.wait [#allocation6], 512  }
  0x26   :  { %282 = vsyncadd [#allocation6], 4294966784  ;;  %vm56_vm0 = vcmask 261120   ;;  %v45_v0 = vld [vmem:[#allocation5] sm:$0xff]  ;;  %v46_v1 = vld [vmem:[#allocation5 + $0x8] sm:$0xff]  ;;  %s289_s11 = smov 64  }
  0x27   :  { %v47_v2 = vld [vmem:[#allocation5 + $0x10] sm:$0xff]  ;;  %v198_v3 = vpack.c.bf16 %v46_v1, %v45_v0  ;;  %v48_v4 = vld [vmem:[#allocation5 + $0x18] sm:$0xff]  ;;  %s290_s12 = smov 96   ;;  %s291_s13 = smov [#allocation7]  }
  0x28   :  { %v43_v5 = vld [vmem:[#allocation2] sm:$0xff]  ;;  %v202_v6 = vpack.c.bf16 %v48_v4, %v47_v2  ;;  %v44_v7 = vld [vmem:[#allocation2 + $0x8] sm:$0xff]  ;;  %s165_s14 = sshll.u32 %s291_s13, 4  ;;  %s166_s14 = int_to_ptr.vmem [resolvable:$true] %s165_s14 }
  0x29   :  { %195 = vmatprep.mubr.msk.f32.mxu0 %vm56_vm0, %v43_v5  ;;  %199 = vmatprep.subr.bf16.mxu0 %v198_v3  ;;  %v178_v8 = vld [vmem:[%s370_s2] ss:$0 sm:$0xff]  ;;  %s257_s2 = scalar_lea.vmem %s166_s14, 768  ;;  %p262_p3 = scmp.lt.s32.totalorder %s166_s14, %s166_s14 }
  0x2a   :  { %201 = vmatpush3.bf16.msra.mxu0 %v198_v3  ;;  %p258_p2 = scmp.ne.s32.totalorder %s166_s14, %s257_s2  ;;  %p263_p4 = scmp.lt.s32.totalorder %s257_s2, %s257_s2 }
  0x2b   :  { %203 = vmatprep.subr.bf16.mxu0 %v202_v6 }
  0x2c   :  { %p264_p5 = por %p263_p4, %p262_p3 }
  0x2e   :  { %205 = vmatpush3.bf16.msra.mxu0 %v202_v6  ;;  %p265_p6 = pnand %p264_p5, %p258_p2 }
  0x31   :  { %196 = vmatmul.mubr.msk.f32.vlgmr.msra.gmra.mrb[0].mxu0 %vm56_vm0, %v44_v7 }
 0x104   :  { %v197_v9 = vpop.f32.mrb[0].mxu0 }
 0x105   :  { %v135_v10 = vadd.f32 %v197_v9, %v178_v8  ;;  %v129_v11 = vpop.f32.mrb[1].mxu0 }
 0x106   :  { %v130_v12 = vadd.f32 %v178_v8, %v129_v11 }
 0x107   :  { %139 = vst.msk [vmem:[#allocation7 + $0x8] sm:$0xff] %vm56_vm0, %v135_v10 }
 0x108   :  { %138 = vst.msk [vmem:[#allocation7] sm:$0xff] %vm56_vm0, %v130_v12  ;;  %151 = vrot.lane.b32.xlu1 %v130_v12, %s289_s11  ;;  %142 = vrot.lane.b32.xlu0 %v130_v12, %s290_s12 }
 0x10c   :  { %153 = vrot.lane.b32.xlu1 %v135_v10, %s289_s11  ;;  %144 = vrot.lane.b32.xlu0 %v135_v10, %s290_s12 }
 0x17a   :  { %v152_v13 = vpop.permute.xlu1 %151  ;;  %v143_v14 = vpop.permute.xlu0 %142 }
 0x17b   :  { %158 = vst.msk [vmem:[#allocation7 + $0x20] sm:$0xff] %vm56_vm0, %v152_v13  ;;  %149 = vst.msk [vmem:[#allocation7 + $0x10] sm:$0xff] %vm56_vm0, %v143_v14 }
 0x17e   :  { %v154_v15 = vpop.permute.xlu1 %153  ;;  %v145_v16 = vpop.permute.xlu0 %144 }
 0x17f   :  { %159 = vst.msk [vmem:[#allocation7 + $0x28] sm:$0xff] %vm56_vm0, %v154_v15  ;;  %150 = vst.msk [vmem:[#allocation7 + $0x18] sm:$0xff] %vm56_vm0, %v145_v16 }
 0x180   :  { %268 = shalt.err (!%p265_p6)
}
 0x181   :  { %s269_s17 = scalar_lea.hbm %s371_s3, 768 }
 0x182   :  { %p270_p7 = scmp.ne.s32.totalorder %s371_s3, %s269_s17  ;;  %p273_p8 = scmp.lt.u32.totalorder %s269_s17, %s371_s3 }
 0x184   :  { %p275_p9 = pnand %p273_p8, %p270_p7 }
 0x186   :  { %278 = shalt.err (!%p275_p9)
}
 0x187   :  { %171 = dma.vmem_to_hbm [thread:$0]  %s166_s14, 768, %s371_s3, [#allocation4], %s286_s22, %s286_s22, %s287_s23  }
 0x188   :  { %283 = dma.done.wait [#allocation4], 768  }
 0x189   :  { %284 = vsyncadd [#allocation4], 4294966528 }
 0x18a   :  { %175 = vsyncpa [#allocation3], 1 }
 0x18b   :  { %176 = vsyncpa [#allocation6], 1 }
 0x18c   :  { %177 = vsyncpa [#allocation4], 1 }

</bundles_post_ra>
